<compile_context>
chip_gen: v5e
topology: v5e:2x2
jax: 0.10.0
libtpu: 0.0.40
codegen_flags: <defaults>
</compile_context>

<pallas_src>
import math
import functools

import jax
import jax.numpy as jnp
from jax.experimental import pallas as pl
from jax.experimental.pallas import tpu as pltpu


def make_pe_buffer(d_model: int, max_len: int = 5000,
                   dtype=jnp.float32) -> jnp.ndarray:
    """Sinusoidal positional-encoding buffer, shape (max_len, 1, d_model)."""
    position = jnp.arange(0, max_len, dtype=jnp.float32)[:, None]            # (max_len, 1)
    div_term = jnp.exp(jnp.arange(0, d_model, 2, dtype=jnp.float32)
                       * (-math.log(10000.0) / d_model))                      # (d_model/2,)
    pe = jnp.zeros((max_len, d_model), dtype=jnp.float32)
    pe = pe.at[:, 0::2].set(jnp.sin(position * div_term))
    pe = pe.at[:, 1::2].set(jnp.cos(position * div_term))
    return pe[:, None, :].astype(dtype)                                       # (max_len, 1, d_model)


# ----------------------------- kernels -------------------------------------

def _pe_eval_kernel(x_ref, pe_ref, o_ref, *, scale):
    # x_ref: (ts, B, D); pe_ref: (ts, 1, D) broadcasts over the batch sublane axis.
    y = x_ref[...] * scale + pe_ref[...]
    o_ref[...] = y.astype(o_ref.dtype)


def _pe_train_kernel(x_ref, pe_ref, bits_ref, o_ref, *, scale, keep_prob):
    # Inverted dropout: keep iff bits < floor(keep_prob * 2^32).
    # 1/keep_prob is folded into the scalar x multiplier and the tiny pe block,
    # so there is no extra full-(ts,B,D) multiply.
    inv_keep = 1.0 / keep_prob
    pe_k = pe_ref[...] * inv_keep                       # (ts, 1, D): ~B x smaller than a block
    y = x_ref[...] * (scale * inv_keep) + pe_k          # broadcasts over B
    threshold = jnp.uint32(min(int(keep_prob * (1 << 32)), (1 << 32) - 1))
    keep = bits_ref[...] < threshold
    o_ref[...] = jnp.where(keep, y, jnp.zeros_like(y)).astype(o_ref.dtype)


# ----------------------------- wrapper --------------------------------------

def positional_encoding(x, pe, *, d_model, dropout_p=0.1, train=False, key=None):
    """x: (S, B, D); pe: (max_len, 1, D). Returns (S, B, D) in x.dtype."""
    S, B, D = x.shape
    assert D == d_model and pe.shape[0] >= S and pe.shape[2] == D
    scale = float(math.sqrt(d_model))
    pe = pe.astype(x.dtype)          # avoid implicit f32 promotion for bf16 inputs

    # --- tile size: VMEM budget + minimum pipeline depth ---------------------
    # Blocks are (ts, B, D): D on lanes, B on sublanes, ts tiles the sequence.
    # ~2 MiB blocks sit at the streaming-add HBM roofline plateau and stay well
    # inside v7x's 64 MiB per-TC VMEM even when double-buffered for x/out/bits.
    itemsize = jnp.dtype(x.dtype).itemsize
    row_bytes = max(1, B * D * itemsize)
    target_block_bytes = 2 << 20
    ts_budget = max(1, target_block_bytes // row_bytes)
    # Never collapse to one block: keep >= 4 grid steps so the software pipeline
    # (and v7x megacore sharding of the "parallel" axis) stays active.
    min_steps = 4
    ts = max(1, min(ts_budget, pl.cdiv(S, min_steps), S))
    grid = (pl.cdiv(S, ts),)
    # TODO(synk): if B*D*itemsize ever exceeds target_block_bytes, add a second
    # grid axis over the lane dimension (128-multiple chunks) instead of ts=1.

    x_spec = pl.BlockSpec((ts, B, D), lambda i: (i, 0, 0))
    pe_spec = pl.BlockSpec((ts, 1, D), lambda i: (i, 0, 0))
    bits_spec = pl.BlockSpec((ts, B, D), lambda i: (i, 0, 0))
    out_spec = pl.BlockSpec((ts, B, D), lambda i: (i, 0, 0))
    out_shape = jax.ShapeDtypeStruct((S, B, D), x.dtype)

    compiler_params = pltpu.CompilerParams(
        dimension_semantics=("parallel",),     # only helps on v7x (2 TCs); harmless elsewhere
        vmem_limit_bytes=32 * 1024 * 1024,     # safe on all generations incl. v7x (64 MiB)
    )

    if (not train) or dropout_p == 0.0:
        # NOTE: for a bare eval-mode scale+add, plain JAX would fuse into the
        # surrounding ops and skip a dedicated HBM round trip; the Pallas path
        # is kept so the train (dropout) path shares one implementation.
        kernel = functools.partial(_pe_eval_kernel, scale=scale)
        return pl.pallas_call(
            kernel,
            out_shape=out_shape,
            grid=grid,
            in_specs=[x_spec, pe_spec],
            out_specs=out_spec,
            compiler_params=compiler_params,
        )(x, pe)

    keep_prob = 1.0 - float(dropout_p)
    if key is None:
        key = jax.random.PRNGKey(0)
    # TODO(synk): replace with pltpu.prng_seed/prng_random_bits once the
    # interpret/CPU fallback supports them; that removes this extra HBM stream.
    bits = jax.random.bits(key, (S, B, D), dtype=jnp.uint32)

    kernel = functools.partial(_pe_train_kernel, scale=scale, keep_prob=keep_prob)
    return pl.pallas_call(
        kernel,
        out_shape=out_shape,
        grid=grid,
        in_specs=[x_spec, pe_spec, bits_spec],
        out_specs=out_spec,
        compiler_params=compiler_params,
    )(x, pe, bits)


# ----------------------------- main ------------------------------------------

if __name__ == "__main__":
    d_model = 32
    max_len = 64          # small max_len for the synthetic buffer
    seq_len = 8
    batch = 2

    key = jax.random.PRNGKey(0)
    kx, kd = jax.random.split(key)
    x = jax.random.normal(kx, (seq_len, batch, d_model), dtype=jnp.float32)
    pe = make_pe_buffer(d_model, max_len)

    # eval mode (dropout is identity): exact, deterministic reference check
    out = positional_encoding(x, pe, d_model=d_model, dropout_p=0.1, train=False)
    out = jax.block_until_ready(out)
    ref = x * math.sqrt(d_model) + pe[:seq_len]
    assert jnp.allclose(out, ref, atol=1e-5, rtol=1e-5), "mismatch vs. reference"

    # training mode (inverted dropout): surviving elements equal ref / keep_prob,
    # the rest are exactly 0.
    # TODO(synk): torch's dropout RNG stream cannot be bit-reproduced; semantics
    # (inverted dropout, 1/keep_prob scaling) are matched instead.
    dropout_p = 0.1
    keep_prob = 1.0 - dropout_p
    out_train = positional_encoding(x, pe, d_model=d_model, dropout_p=dropout_p,
                                    train=True, key=kd)
    out_train = jax.block_until_ready(out_train)
    kept = out_train != 0.0
    assert jnp.allclose(jnp.where(kept, out_train * keep_prob, ref), ref,
                        atol=1e-4, rtol=1e-4), "dropout-kept values mismatch"

    print("KERNEL_OK")
</pallas_src>

<mosaic_0001>
module attributes {stable_mosaic.version = 11 : i64} {
  func.func @_pe_eval_kernel(%arg0: i32, %arg1: memref<2x2x32xf32, #tpu.memory_space<vmem>>, %arg2: memref<2x1x32xf32, #tpu.memory_space<vmem>>, %arg3: memref<2x2x32xf32, #tpu.memory_space<vmem>>) attributes {dimension_semantics = [#tpu.dimension_semantics<parallel>], iteration_bounds = array<i64: 4>, scalar_prefetch = 0 : i64, scratch_operands = 0 : i64, tpu.core_type = #tpu.core_type<tc>, window_params = [{transform_indices = @transform_0, window_bounds = array<i64: 2, 2, 32>}, {transform_indices = @transform_1, window_bounds = array<i64: 2, 1, 32>}, {transform_indices = @transform_2, window_bounds = array<i64: 2, 2, 32>}]} {
    %c0 = arith.constant 0 : index
    %c0_0 = arith.constant 0 : index
    %c0_1 = arith.constant 0 : index
    %0 = vector.load %arg1[%c0, %c0_0, %c0_1] : memref<2x2x32xf32, #tpu.memory_space<vmem>>, vector<2x2x32xf32>
    %cst = arith.constant 5.65685415 : f32
    %1 = vector.broadcast %cst : f32 to vector<2x2x32xf32>
    %2 = arith.mulf %0, %1 : vector<2x2x32xf32>
    %c0_2 = arith.constant 0 : index
    %c0_3 = arith.constant 0 : index
    %c0_4 = arith.constant 0 : index
    %3 = vector.load %arg2[%c0_2, %c0_3, %c0_4] : memref<2x1x32xf32, #tpu.memory_space<vmem>>, vector<2x1x32xf32>
    %4 = vector.broadcast %3 : vector<2x1x32xf32> to vector<2x2x32xf32>
    %5 = arith.addf %2, %4 : vector<2x2x32xf32>
    %c0_5 = arith.constant 0 : index
    %c0_6 = arith.constant 0 : index
    %c0_7 = arith.constant 0 : index
    %6 = vector.load %arg3[%c0_5, %c0_6, %c0_7] : memref<2x2x32xf32, #tpu.memory_space<vmem>>, vector<2x2x32xf32>
    tpu.vector_store %arg3[%c0_5, %c0_6, %c0_7], %5 {strides = array<i32>} : memref<2x2x32xf32, #tpu.memory_space<vmem>>, vector<2x2x32xf32>,
    return
  }
  func.func @transform_0(%arg0: i32) -> (i32, i32, i32) {
    %c0_i32 = arith.constant 0 : i32
    %c0_i32_0 = arith.constant 0 : i32
    %c0_i32_1 = arith.constant 0 : i32
    return %arg0, %c0_i32, %c0_i32_0 : i32, i32, i32
  }
  func.func @transform_1(%arg0: i32) -> (i32, i32, i32) {
    %c0_i32 = arith.constant 0 : i32
    %c0_i32_0 = arith.constant 0 : i32
    %c0_i32_1 = arith.constant 0 : i32
    return %arg0, %c0_i32, %c0_i32_0 : i32, i32, i32
  }
  func.func @transform_2(%arg0: i32) -> (i32, i32, i32) {
    %c0_i32 = arith.constant 0 : i32
    %c0_i32_0 = arith.constant 0 : i32
    %c0_i32_1 = arith.constant 0 : i32
    return %arg0, %c0_i32, %c0_i32_0 : i32, i32, i32
  }
}

</mosaic_0001>

<bundles_post_ra>
// kernel: tpu_custom_call.1
= control target key start
LH: loop header
LB: loop body
LE: loop exit
PB: predicated region body
PF: predicated region fallthrough
CT: control target
= control target key end

     0   :  { %7 = vsyncpa [#allocation3], 0  ;;  %s498_s0 = inlined_call_operand.vmem [shape: f32[8,2,32], index: 0, kind: input, shape index: {}]   ;;  %s499_s1 = inlined_call_operand.vmem [shape: f32[64,1,32], index: 1, kind: input, shape index: {}]   ;;  %s500_s2 = inlined_call_operand.hbm [shape: f32[8,2,32], index: 2, kind: output, shape index: {}]  }
   0x1   :  { %9 = vsyncpa [#allocation3 + $0x1], 0  ;;  %s406_s9 = smov 0   ;;  %s408_s10 = smov 0  }
   0x2   :  { %s410_s11 = smov 0   ;;  %s412_s12 = smov 0  }
   0x3 LB: > { %s427_s13 = sadd.s32 4294967295, %s387_s12   ;;  %s268_s14 = sadd.s32 4294967294, %s387_s12   ;;  %s387_s12 = sphi %s412_s12, %s506_s12   ;;  %s383_s11 = sphi %s410_s11, %s505_s11   ;;  %s379_s10 = sphi %s408_s10, %s504_s10   ;;  %s375_s9 = sphi %s406_s9, %s503_s9  }
   0x4   : > { %s431_s15 = sadd.s32 1, %s387_s12   ;;  %s74_s16 = sadd.s32 1, %s383_s11 }
   0x5   : > { %s71_s17 = ssub.s32 %s387_s12, %s431_s15  ;;  %p84_p0 = scmp.ne.s32.totalorder %s383_s11, %s379_s10 }
   0x6   : > { %p72_p1 = scmp.eq.s32.totalorder %s71_s17, 0  ;;  %p85_p2 = scmp.eq.s32.totalorder %s427_s13, 3 }
   0x7   : > { %p90_p3 = scmp.ne.s32.totalorder %s379_s10, %s375_s9  ;;  %p91_p4 = scmp.eq.s32.totalorder %s268_s14, 3 }
   0x8   : > { %s442_s18 = scalar_select %p72_p1, %s383_s11, %s74_s16  }
   0x9   : > { %p444_p5 = por %p85_p2, %p84_p0  ;;  %p448_p6 = por %p91_p4, %p90_p3 }
   0xa   : > { %p271_p7 = scmp.ge.s32.totalorder %s387_s12, 1  ;;  %p126_p8 = scmp.lt.s32.totalorder %s387_s12, 5 }
   0xc   : > { %p127_p9 = pnand %p271_p7, %p126_p8 }
   0xd   : > { %s149_s21 = sand.u32 (!%p127_p9), 1, %s379_s10   ;;  %s273_s22 = sshll.u32 (!%p127_p9), %s427_s13, 1 }
   0xe   : > { %130 = sbr.rel (%p127_p9) target bundleno = 35 (0x23), region = 28  ;;  %s272_s23 = sshll.u32 (!%p127_p9), %s149_s21, 2 }
   0xf   : > { %p153_p10 = scmp.lt.s32.totalorder (!%p127_p9), %s273_s22, 7  ;;  %p159_p11 = scmp.lt.s32.totalorder (!%p127_p9), %s273_s22, 63 }
  0x10   : > { %s151_s4 = scalar_lea.vmem (!%p127_p9), [#allocation2], %s272_s23  ;;  %s281_s6 = sshll.u32 (!%p127_p9), %s427_s13, 2 }
  0x11   : > { %s194_s5 = sshll.u32 (!%p127_p9), %s151_s4, 4  ;;  %s193_s14 = scalar_lea.hbm (!%p127_p9), %s500_s2, %s281_s6  ;;  %s463_s5 = int_to_ptr.vmem [resolvable:$true] %s194_s5 }
  0x12   : > { %s196_s16 = sshll.u32 (!%p127_p9), %s193_s14, 4  ;;  %s182_s17 = scalar_lea.sflag (!%p127_p9), [#allocation3], %s149_s21  ;;  %s197_s16 = int_to_ptr.hbm [resolvable:$true] %s196_s16 }
  0x13   : > { %s154_s24 = scalar_select %p153_p10, %s273_s22, 7  ;;  %vm178_vm0 = vcmask 254976  }
  0x14   : > { %s508_s22 = smov (!%p159_p11, %s273_s22), 63 }
  0x15   : > { %s274_s25 = sshll.u32 %s154_s24, 1  ;;  %s161_s3 = scalar_lea.vmem %s499_s1, %s508_s22 }
  0x16   : > { %s156_s28 = scalar_lea.vmem %s498_s0, %s274_s25  ;;  %v323_v1 = vld [vmem:[%s161_s3] ss:$0 sm:$0xff]  ;;  %v324_v5 = vld [vmem:[%s161_s3 + $0x1] ss:$0 sm:$0xff]  ;;  %s339_s22 = sshra.s32 %s197_s16, 4  ;;  %s340_s22 = int_to_ptr.hbm [resolvable:$true] %s339_s22 }
  0x17   : > { %v164_v0 = vld [vmem:[%s156_s28] sm:$0x3]  ;;  %v165_v3 = vld [vmem:[%s156_s28 + $0x2] sm:$0x3]  ;;  %s341_s13 = scalar_lea.hbm %s340_s22, 4  ;;  %s345_s25 = scalar_lea.hbm %s500_s2, 16 }
  0x18   : > { %v166_v2 = vmul.f32 5.656854, %v164_v0  ;;  %v167_v4 = vmul.f32 5.656854, %v165_v3  ;;  %p342_p12 = scmp.ne.s32.totalorder %s340_s22, %s341_s13  ;;  %p346_p1 = scmp.lt.s32.totalorder %s340_s22, %s500_s2 }
  0x19   : > { %p347_p2 = scmp.lt.s32.totalorder %s345_s25, %s341_s13 }
  0x1a   : > { %v176_v6 = vadd.f32 %v323_v1, %v166_v2  ;;  %v177_v7 = vadd.f32 %v324_v5, %v167_v4  ;;  %p343_p13 = pnand %p342_p12, %p444_p5 }
  0x1b   : > { %p348_p3 = por %p347_p2, %p346_p1 }
  0x1c   : > { %179 = vst.msk [vmem:[%s151_s4] sm:$0x3] %vm178_vm0, %v176_v6  ;;  %p344_p0 = pneg %p343_p13 }
  0x1d   : > { %180 = vst.msk [vmem:[%s151_s4 + $0x2] sm:$0x3] %vm178_vm0, %v177_v7 }
  0x1e   : > { %p349_p4 = pnand %p348_p3, %p344_p0 }
  0x20   : > { %352 = shalt.err (!%p349_p4)
}
  0x21   : > { %s389_s21 = smov 32   ;;  %s390_s28 = smov 2  }
  0x22   : > { %282 = dma.vmem_to_hbm [thread:$0]  (%p444_p5), %s463_s5, 64, %s197_s16, %s182_s17, %s389_s21, %s389_s21, %s390_s28  }
  0x23 PF: > { %p288_p7 = scmp.ge.s32.totalorder %s387_s12, 2  ;;  %s211_s29 = sand.u32 1, %s375_s9  }
  0x24   : > { %s212_s30 = scalar_lea.sflag [#allocation3], %s211_s29 }
  0x25   : > { %p285_p8 = pnand %p288_p7, %p448_p6 }
  0x27   : > { %p286_p9 = pneg %p285_p8 }
  0x29   : > { %370 = dma.done.wait (%p286_p9), %s212_s30, 64  }
  0x2a   : > { %372 = vsyncadd (%p286_p9), %s212_s30, 4294967232  ;;  %p12_p10 = scmp.ge.s32.totalorder %s431_s15, 6   ;;  %s503_s9 = smov %s379_s10 }
  0x2b   : > { %s504_s10 = smov %s383_s11  ;;  %s505_s11 = smov %s442_s18 }
  0x2c   : > { %s506_s12 = smov %s431_s15  ;;  %14 = sbr.rel (!%p12_p10) target bundleno = 3 (0x3), region = 66 }
  0x31   :  { %218 = vsyncpa [#allocation3], 1 }
  0x32   :  { %220 = vsyncpa [#allocation3 + $0x1], 1 }

</bundles_post_ra>
